<compile_context>
chip_gen: v7x
topology: tpu7x:2x2x1
jax: 0.10.0
libtpu: 0.0.40
codegen_flags: <defaults>
</compile_context>

<pallas_src>
import jax
import jax.numpy as jnp
from jax.experimental import pallas as pl
from jax.experimental.pallas import tpu as pltpu


# ----------------------------- kernels ------------------------------------- #

def _sims_kernel(x_ref, n_ref, im_ref, pos_ref, neg_ref):
    """Per-tile row-wise dot products, stored lane-dense as (1, TB)."""
    x = x_ref[...].astype(jnp.float32)       # [TB, D]
    n = n_ref[...].astype(jnp.float32)       # [TB, D]
    im = im_ref[...].astype(jnp.float32)     # [TB, D]
    pos_ref[...] = jnp.sum(x * im, axis=-1).reshape(pos_ref.shape)   # (1, TB)
    neg_ref[...] = jnp.sum(n * im, axis=-1).reshape(neg_ref.shape)   # (1, TB)


def _make_loss_kernel(alpha_f):
    """Fused fast path (return_sims=False): one reduction + in-kernel logsigmoid."""
    def _loss_kernel(x_ref, n_ref, im_ref, logsig_ref):
        x = x_ref[...].astype(jnp.float32)
        n = n_ref[...].astype(jnp.float32)
        im = im_ref[...].astype(jnp.float32)
        z = jnp.sum((x - n) * im, axis=-1) * alpha_f                 # (TB,)
        # numerically stable logsigmoid(z) = min(z, 0) - log1p(exp(-|z|))
        logsig = jnp.minimum(z, 0.0) - jnp.log1p(jnp.exp(-jnp.abs(z)))
        logsig_ref[...] = logsig.reshape(logsig_ref.shape)           # (1, TB)
    return _loss_kernel


# ----------------------------- wrapper -------------------------------------- #

def _round_up(x, m):
    return ((x + m - 1) // m) * m


def _choose_tile_rows(batch, feat, itemsize, budget_bytes=24 << 20):
    """Largest batch tile whose double-buffered 3 inputs fit a conservative VMEM
    budget (safe on v7x; larger VMEM chips simply run the same tiles)."""
    tb = budget_bytes // (2 * 3 * max(feat, 1) * itemsize)
    tb = int(max(8, min(tb, 2048)))
    tb = (tb // 128) * 128 if tb >= 128 else (tb // 8) * 8
    return min(tb, _round_up(batch, 8))


def make_reward_clip_forward(alpha, tile_rows=None):
    """Returns fwd(input_embs, neg_input_embs, image_embs, return_sims=False)."""
    alpha_f = float(alpha)
    loss_kernel = _make_loss_kernel(alpha_f)

    def fwd(input_embs, neg_input_embs, image_embs, return_sims: bool = False):
        B, D = input_embs.shape
        assert neg_input_embs.shape == (B, D) and image_embs.shape == (B, D)
        itemsize = jnp.dtype(input_embs.dtype).itemsize

        TB = tile_rows if tile_rows is not None else _choose_tile_rows(B, D, itemsize)
        B_pad = _round_up(B, TB)
        num_tiles = B_pad // TB

        def pad(a):
            return a if B_pad == B else jnp.pad(a, ((0, B_pad - B), (0, 0)))

        x, n, im = pad(input_embs), pad(neg_input_embs), pad(image_embs)

        in_specs = [pl.BlockSpec((TB, D), lambda i: (i, 0)) for _ in range(3)]
        out_block = pl.BlockSpec((1, TB), lambda i: (i, 0))
        out_sds = jax.ShapeDtypeStruct((num_tiles, TB), jnp.float32)

        # Double-buffered inputs + lane-dense outputs, with headroom; capped so it
        # is valid on v7x (64 MiB physical VMEM) as well as v5e/v6e.
        vmem_needed = 2 * (3 * TB * D * itemsize + 2 * TB * 4)
        vmem_limit = int(min(64 << 20, max(2 * vmem_needed, 16 << 20)))

        compiler_params = pltpu.CompilerParams(
            dimension_semantics=("parallel",),
            vmem_limit_bytes=vmem_limit,
        )
        cost = pl.CostEstimate(
            flops=4 * B_pad * D,
            transcendentals=2 * B_pad,
            bytes_accessed=3 * B_pad * D * itemsize + 2 * B_pad * 4,
        )

        if return_sims:
            pos2d, neg2d = pl.pallas_call(
                _sims_kernel,
                grid_spec=pltpu.PrefetchScalarGridSpec(
                    num_scalar_prefetch=0,
                    grid=(num_tiles,),
                    in_specs=in_specs,
                    out_specs=(out_block, pl.BlockSpec((1, TB), lambda i: (i, 0))),
                ),
                out_shape=(out_sds, out_sds),
                compiler_params=compiler_params,
                cost_estimate=cost,
            )(x, n, im)
            pos = pos2d.reshape(-1)[:B]
            neg = neg2d.reshape(-1)[:B]
            z = (pos - neg) * alpha_f
            logsig = jnp.minimum(z, 0.0) - jnp.log1p(jnp.exp(-jnp.abs(z)))
            loss = -jnp.mean(logsig)
            return loss, {"pos_sim": pos, "neg_sim": neg}

        # Fast path: fused single reduction, single lane-dense output.
        logsig2d = pl.pallas_call(
            loss_kernel,
            grid_spec=pltpu.PrefetchScalarGridSpec(
                num_scalar_prefetch=0,
                grid=(num_tiles,),
                in_specs=in_specs,
                out_specs=out_block,
            ),
            out_shape=out_sds,
            compiler_params=compiler_params,
            cost_estimate=cost,
        )(x, n, im)
        loss = -jnp.sum(logsig2d.reshape(-1)[:B]) / B
        return loss

    return fwd


# ----------------------------- reference ------------------------------------ #

def _reference_forward(input_embs, neg_input_embs, image_embs, alpha):
    """Pure-JAX replica of the PyTorch forward, for verification."""
    img_t = image_embs.T
    rewards_pos = jnp.diagonal(input_embs @ img_t)
    rewards_neg = jnp.diagonal(neg_input_embs @ img_t)
    z = (rewards_pos - rewards_neg) * alpha
    logsig = jnp.minimum(z, 0.0) - jnp.log1p(jnp.exp(-jnp.abs(z)))
    return -jnp.mean(logsig), rewards_pos, rewards_neg


# ----------------------------- demo / test ---------------------------------- #

if __name__ == "__main__":
    key = jax.random.PRNGKey(0)
    ALPHA = 3  # self.alpha (int in the module)

    def _l2norm(a):  # CLIP-style L2 normalization (as encode_* would produce)
        return a / jnp.linalg.norm(a, axis=-1, keepdims=True)

    # Config 1: small single-tile case (batch=8 embedding pairs, hidden=32).
    # Config 2: exercises multi-tile grid + batch padding (batch=20, TB=8 -> 3 tiles).
    configs = [
        dict(B=8, D=32, tile_rows=None),
        dict(B=20, D=128, tile_rows=8),
    ]

    for idx, cfg in enumerate(configs):
        B, D = cfg["B"], cfg["D"]
        k = jax.random.fold_in(key, idx)
        k1, k2, k3 = jax.random.split(k, 3)
        input_embs = _l2norm(jax.random.normal(k1, (B, D), dtype=jnp.float32))
        neg_input_embs = _l2norm(jax.random.normal(k2, (B, D), dtype=jnp.float32))
        image_embs = _l2norm(jax.random.normal(k3, (B, D), dtype=jnp.float32))

        fwd = make_reward_clip_forward(ALPHA, tile_rows=cfg["tile_rows"])
        loss, sims = fwd(input_embs, neg_input_embs, image_embs, return_sims=True)
        loss_only = fwd(input_embs, neg_input_embs, image_embs, return_sims=False)
        jax.block_until_ready((loss, sims, loss_only))

        ref_loss, ref_pos, ref_neg = _reference_forward(
            input_embs, neg_input_embs, image_embs, ALPHA
        )
        assert jnp.allclose(loss, ref_loss, atol=1e-5), (loss, ref_loss)
        assert jnp.allclose(loss_only, ref_loss, atol=1e-5), (loss_only, ref_loss)
        assert jnp.allclose(sims["pos_sim"], ref_pos, atol=1e-5)
        assert jnp.allclose(sims["neg_sim"], ref_neg, atol=1e-5)

    print("KERNEL_OK")
</pallas_src>

<mosaic_0001>
module attributes {stable_mosaic.version = 11 : i64} {
  func.func @_sims_kernel(%arg0: i32, %arg1: memref<8x32xf32, #tpu.memory_space<vmem>>, %arg2: memref<8x32xf32, #tpu.memory_space<vmem>>, %arg3: memref<8x32xf32, #tpu.memory_space<vmem>>, %arg4: memref<1x8xf32, #tpu.memory_space<vmem>>, %arg5: memref<1x8xf32, #tpu.memory_space<vmem>>) attributes {dimension_semantics = [#tpu.dimension_semantics<parallel>], iteration_bounds = array<i64: 1>, scalar_prefetch = 0 : i64, scratch_operands = 0 : i64, tpu.core_type = #tpu.core_type<tc>, window_params = [{transform_indices = @transform_0, window_bounds = array<i64: 8, 32>}, {transform_indices = @transform_1, window_bounds = array<i64: 8, 32>}, {transform_indices = @transform_2, window_bounds = array<i64: 8, 32>}, {transform_indices = @transform_3, window_bounds = array<i64: 1, 8>}, {transform_indices = @transform_4, window_bounds = array<i64: 1, 8>}]} {
    %c0 = arith.constant 0 : index
    %c0_0 = arith.constant 0 : index
    %0 = vector.load %arg1[%c0, %c0_0] : memref<8x32xf32, #tpu.memory_space<vmem>>, vector<8x32xf32>
    %c0_1 = arith.constant 0 : index
    %c0_2 = arith.constant 0 : index
    %1 = vector.load %arg2[%c0_1, %c0_2] : memref<8x32xf32, #tpu.memory_space<vmem>>, vector<8x32xf32>
    %c0_3 = arith.constant 0 : index
    %c0_4 = arith.constant 0 : index
    %2 = vector.load %arg3[%c0_3, %c0_4] : memref<8x32xf32, #tpu.memory_space<vmem>>, vector<8x32xf32>
    %3 = arith.mulf %0, %2 : vector<8x32xf32>
    %cst = arith.constant dense<0.000000e+00> : vector<8xf32>
    %4 = vector.multi_reduction <add>, %3, %cst [1] : vector<8x32xf32> to vector<8xf32>
    %5 = vector.shape_cast %4 : vector<8xf32> to vector<1x8xf32>
    %c0_5 = arith.constant 0 : index
    %c0_6 = arith.constant 0 : index
    %6 = vector.load %arg4[%c0_5, %c0_6] : memref<1x8xf32, #tpu.memory_space<vmem>>, vector<1x8xf32>
    tpu.vector_store %arg4[%c0_5, %c0_6], %5 {strides = array<i32>} : memref<1x8xf32, #tpu.memory_space<vmem>>, vector<1x8xf32>,
    %7 = arith.mulf %1, %2 : vector<8x32xf32>
    %cst_7 = arith.constant dense<0.000000e+00> : vector<8xf32>
    %8 = vector.multi_reduction <add>, %7, %cst_7 [1] : vector<8x32xf32> to vector<8xf32>
    %9 = vector.shape_cast %8 : vector<8xf32> to vector<1x8xf32>
    %c0_8 = arith.constant 0 : index
    %c0_9 = arith.constant 0 : index
    %10 = vector.load %arg5[%c0_8, %c0_9] : memref<1x8xf32, #tpu.memory_space<vmem>>, vector<1x8xf32>
    tpu.vector_store %arg5[%c0_8, %c0_9], %9 {strides = array<i32>} : memref<1x8xf32, #tpu.memory_space<vmem>>, vector<1x8xf32>,
    return
  }
  func.func @transform_0(%arg0: i32) -> (i32, i32) {
    %c0_i32 = arith.constant 0 : i32
    %c0_i32_0 = arith.constant 0 : i32
    return %arg0, %c0_i32 : i32, i32
  }
  func.func @transform_1(%arg0: i32) -> (i32, i32) {
    %c0_i32 = arith.constant 0 : i32
    %c0_i32_0 = arith.constant 0 : i32
    return %arg0, %c0_i32 : i32, i32
  }
  func.func @transform_2(%arg0: i32) -> (i32, i32) {
    %c0_i32 = arith.constant 0 : i32
    %c0_i32_0 = arith.constant 0 : i32
    return %arg0, %c0_i32 : i32, i32
  }
  func.func @transform_3(%arg0: i32) -> (i32, i32) {
    %c0_i32 = arith.constant 0 : i32
    %c0_i32_0 = arith.constant 0 : i32
    return %arg0, %c0_i32 : i32, i32
  }
  func.func @transform_4(%arg0: i32) -> (i32, i32) {
    %c0_i32 = arith.constant 0 : i32
    %c0_i32_0 = arith.constant 0 : i32
    return %arg0, %c0_i32 : i32, i32
  }
}

</mosaic_0001>

<bundles_post_ra>
// kernel: tpu_custom_call.1
= control target key start
LH: loop header
LB: loop body
LE: loop exit
PB: predicated region body
PF: predicated region fallthrough
CT: control target
= control target key end

     0   :  { %10 = vsyncpa [#allocation3], 0  ;;  %s327_s0 = inlined_call_operand.hbm [shape: f32[8,32], index: 0, kind: input, shape index: {}]   ;;  %s328_s1 = inlined_call_operand.hbm [shape: f32[8,32], index: 1, kind: input, shape index: {}]   ;;  %s329_s2 = inlined_call_operand.hbm [shape: f32[8,32], index: 2, kind: input, shape index: {}]   ;;  %s330_s3 = inlined_call_operand.hbm [shape: f32[1,8], index: 3, kind: output, shape index: {0}]   ;;  %s331_s4 = inlined_call_operand.hbm [shape: f32[1,8], index: 4, kind: output, shape index: {1}]  }
   0x1   :  { %11 = vsyncpa [#allocation6], 0 }
   0x2   :  { %12 = vsyncpa [#allocation4], 0 }
   0x3   :  { %13 = vsyncpa [#allocation10], 0  ;;  %s235_s15 = smov [#allocation5]   ;;  %s236_s17 = smov [#allocation2]  }
   0x4   :  { %s30_s16 = sshll.u32 %s235_s15, 4  ;;  %s20_s18 = sshll.u32 %s236_s17, 4  ;;  %s31_s16 = int_to_ptr.vmem [resolvable:$true] %s30_s16  ;;  %s21_s18 = int_to_ptr.vmem [resolvable:$true] %s20_s18 }
   0x5   :  { %s117_s21 = scalar_lea.hbm %s328_s1, 128 }
   0x6   :  { %p118_p0 = scmp.ne.s32.totalorder %s328_s1, %s117_s21  ;;  %p121_p1 = scmp.lt.u32.totalorder %s117_s21, %s328_s1 }
   0x8   :  { %p123_p2 = pnand %p121_p1, %p118_p0 }
   0xa   :  { %126 = shalt.err (!%p123_p2)
}
   0xb   :  { %s127_s26 = scalar_lea.vmem %s31_s16, 128  ;;  %p132_p4 = scmp.lt.s32.totalorder %s31_s16, %s31_s16 }
   0xc   :  { %p128_p3 = scmp.ne.s32.totalorder %s31_s16, %s127_s26  ;;  %p133_p5 = scmp.lt.s32.totalorder %s127_s26, %s127_s26 }
   0xe   :  { %p134_p6 = por %p133_p5, %p132_p4 }
  0x10   :  { %p135_p7 = pnand %p134_p6, %p128_p3 }
  0x12   :  { %138 = shalt.err (!%p135_p7)
}
  0x13   :  { %33 = dma.hbm_to_vmem [thread:$0]  %s328_s1, 128, %s31_s16, [#allocation6]  }
  0x14   :  { %s139_s5 = scalar_lea.hbm %s327_s0, 128 }
  0x15   :  { %p140_p8 = scmp.ne.s32.totalorder %s327_s0, %s139_s5  ;;  %p143_p9 = scmp.lt.u32.totalorder %s139_s5, %s327_s0 }
  0x17   :  { %p145_p10 = pnand %p143_p9, %p140_p8 }
  0x19   :  { %148 = shalt.err (!%p145_p10)
}
  0x1a   :  { %s149_s10 = scalar_lea.vmem %s21_s18, 128  ;;  %p154_p12 = scmp.lt.s32.totalorder %s21_s18, %s21_s18 }
  0x1b   :  { %p150_p11 = scmp.ne.s32.totalorder %s21_s18, %s149_s10  ;;  %p155_p13 = scmp.lt.s32.totalorder %s149_s10, %s149_s10 }
  0x1d   :  { %p156_p0 = por %p155_p13, %p154_p12 }
  0x1f   :  { %p157_p1 = pnand %p156_p0, %p150_p11 }
  0x21   :  { %160 = shalt.err (!%p157_p1)
}
  0x22   :  { %23 = dma.hbm_to_vmem [thread:$0]  %s327_s0, 128, %s21_s18, [#allocation3]  }
  0x23   :  { %s237_s12 = smov [#allocation7]   ;;  %s161_s16 = scalar_lea.hbm %s329_s2, 128 }
  0x24   :  { %s40_s13 = sshll.u32 %s237_s12, 4  ;;  %p162_p2 = scmp.ne.s32.totalorder %s329_s2, %s161_s16  ;;  %s41_s13 = int_to_ptr.vmem [resolvable:$true] %s40_s13 }
  0x25   :  { %p165_p3 = scmp.lt.u32.totalorder %s161_s16, %s329_s2 }
  0x27   :  { %p167_p4 = pnand %p165_p3, %p162_p2 }
  0x29   :  { %170 = shalt.err (!%p167_p4)
}
  0x2a   :  { %s171_s22 = scalar_lea.vmem %s41_s13, 128  ;;  %p176_p6 = scmp.lt.s32.totalorder %s41_s13, %s41_s13 }
  0x2b   :  { %p172_p5 = scmp.ne.s32.totalorder %s41_s13, %s171_s22  ;;  %p177_p7 = scmp.lt.s32.totalorder %s171_s22, %s171_s22 }
  0x2d   :  { %p178_p8 = por %p177_p7, %p176_p6 }
  0x2f   :  { %p179_p9 = pnand %p178_p8, %p172_p5 }
  0x31   :  { %182 = shalt.err (!%p179_p9)
}
  0x32   :  { %43 = dma.hbm_to_vmem [thread:$0]  %s329_s2, 128, %s41_s13, [#allocation6]  }
  0x33   :  { %227 = dma.done.wait [#allocation3], 128  }
  0x34   :  { %228 = vsyncadd [#allocation3], 4294967168 }
  0x35   :  { %229 = dma.done.wait [#allocation6], 256  }
  0x36   :  { %230 = vsyncadd [#allocation6], 4294967040  ;;  %v53_v0 = vld [vmem:[#allocation2] sm:$0xff]  ;;  %v55_v1 = vld [vmem:[#allocation7] sm:$0xff]  ;;  %vm57_vm0 = vcmask 261120   ;;  %v62_v7 = vlaneseq  ;;  %s238_s23 = smov [#allocation8]  }
  0x37   :  { %v54_v2 = vld [vmem:[#allocation5] sm:$0xff]  ;;  %v56_v3 = vmul.f32 %v55_v1, %v53_v0  ;;  %s88_s2 = sshll.u32 %s238_s23, 4  ;;  %vm69_vm1 = vcmask 57344   ;;  %s239_s24 = smov [#allocation9]   ;;  %s89_s2 = int_to_ptr.vmem [resolvable:$true] %s88_s2 }
  0x38   :  { %v71_v4 = vmul.f32 %v55_v1, %v54_v2  ;;  %v63_v8 = vand.u32 127, %v62_v7  ;;  %v65_v9 = vshrl.u32 %v62_v7, 7  ;;  %s98_s25 = sshll.u32 %s239_s24, 4  ;;  %s183_s26 = scalar_lea.vmem %s89_s2, 16  ;;  %s99_s25 = int_to_ptr.vmem [resolvable:$true] %s98_s25 }
  0x39   :  { %v58_v5 = vsel %vm57_vm0, %v56_v3, 0.0  ;;  %p184_p10 = scmp.ne.s32.totalorder %s89_s2, %s183_s26  ;;  %s187_s27 = scalar_lea.vmem %s89_s2, 32 }
  0x3a   :  { %59 = vadd.xlane.f32.xlu0 %v58_v5  ;;  %v72_v6 = vsel %vm57_vm0, %v71_v4, 0.0  ;;  %v66_v10 = vsub.s32 %v63_v8, %v65_v9  ;;  %p188_p11 = scmp.lt.s32.totalorder %s89_s2, %s89_s2  ;;  %p189_p12 = scmp.lt.s32.totalorder %s187_s27, %s183_s26 }
  0x3c   :  { %p190_p13 = por %p189_p12, %p188_p11 }
  0x3e   :  { %73 = vadd.xlane.f32.xlu0 %v72_v6  ;;  %p191_p0 = pnand %p190_p13, %p184_p10 }
  0xc7   :  { %v60_v11 = vpop.xlane.xlu0 %59 }
  0xc8   :  { %v67_v12 = vrot.slane %v60_v11, %v66_v10 }
  0xca   :  { %70 = vst.msk [vmem:[#allocation8] sm:$0x1] %vm69_vm1, %v67_v12 }
  0xcb   :  { %v74_v13 = vpop.xlane.xlu0 %73 }
  0xcc   :  { %194 = shalt.err (!%p191_p0)
}
  0xcd   :  { %s195_s30 = scalar_lea.hbm %s330_s3, 16 }
  0xce   :  { %p196_p1 = scmp.ne.s32.totalorder %s330_s3, %s195_s30  ;;  %p199_p2 = scmp.lt.u32.totalorder %s195_s30, %s330_s3 }
  0xd0   :  { %p201_p3 = pnand %p199_p2, %p196_p1 }
  0xd2   :  { %204 = shalt.err (!%p201_p3)
}
  0xd3   :  { %91 = dma.vmem_to_hbm [thread:$0]  %s89_s2, 16, %s330_s3, [#allocation4]   ;;  %v79_v14 = vrot.slane %v74_v13, %v66_v10 }
  0xd4   :  { %s205_s1 = scalar_lea.vmem %s99_s25, 16  ;;  %s209_s11 = scalar_lea.vmem %s99_s25, 32 }
  0xd5   :  { %81 = vst.msk [vmem:[#allocation9] sm:$0x1] %vm69_vm1, %v79_v14  ;;  %p206_p4 = scmp.ne.s32.totalorder %s99_s25, %s205_s1  ;;  %p210_p5 = scmp.lt.s32.totalorder %s99_s25, %s99_s25 }
  0xd6   :  { %p211_p6 = scmp.lt.s32.totalorder %s209_s11, %s205_s1 }
  0xd8   :  { %p212_p7 = por %p211_p6, %p210_p5 }
  0xda   :  { %p213_p8 = pnand %p212_p7, %p206_p4 }
  0xdc   :  { %216 = shalt.err (!%p213_p8)
}
  0xdd   :  { %s217_s14 = scalar_lea.hbm %s331_s4, 16 }
  0xde   :  { %p218_p9 = scmp.ne.s32.totalorder %s331_s4, %s217_s14  ;;  %p221_p10 = scmp.lt.u32.totalorder %s217_s14, %s331_s4 }
  0xe0   :  { %p223_p11 = pnand %p221_p10, %p218_p9 }
  0xe2   :  { %226 = shalt.err (!%p223_p11)
}
  0xe3   :  { %101 = dma.vmem_to_hbm [thread:$0]  %s99_s25, 16, %s331_s4, [#allocation10]  }
  0xe4   :  { %231 = dma.done.wait [#allocation4], 16  }
  0xe5   :  { %232 = vsyncadd [#allocation4], 4294967280 }
  0xe6   :  { %233 = dma.done.wait [#allocation10], 16  }
  0xe7   :  { %234 = vsyncadd [#allocation10], 4294967280 }
  0xe8   :  { %108 = vsyncpa [#allocation3], 1 }
  0xe9   :  { %109 = vsyncpa [#allocation6], 1 }
  0xea   :  { %110 = vsyncpa [#allocation4], 1 }
  0xeb   :  { %111 = vsyncpa [#allocation10], 1 }

</bundles_post_ra>
